<compile_context>
chip_gen: v6e
topology: v6e:2x2x1
jax: 0.10.0
libtpu: 0.0.40
codegen_flags: <defaults>
</compile_context>

<pallas_src>
import jax
import jax.numpy as jnp
from jax.experimental import pallas as pl
from jax.experimental.pallas import tpu as pltpu


# ---------------------------------------------------------------------------
# Kernels
# ---------------------------------------------------------------------------

def _aspect_bias_kernel(am_ref,    # VMEM [B, H]  mean-pooled boundary rows
                        w1a_ref,   # VMEM [H, H]  aspect half of W1 ([in, out])
                        b1_ref,    # VMEM [1, H]  f32
                        o_ref):    # VMEM [B, H]  f32 per-batch bias (includes b1)
    o_ref[...] = (jnp.dot(am_ref[...], w1a_ref[...],
                          preferred_element_type=jnp.float32) + b1_ref[...])


def _ffn_kernel(x_ref,      # VMEM [TS, H]    txt_embed tile (batch squeezed)
                abias_ref,  # VMEM [1, H] f32 precomputed aspect bias (includes b1)
                w1t_ref,    # VMEM [H, H]     text half of W1 ([in, out])
                w2_ref,     # VMEM [H, Ppad]  W2, lane-padded columns
                b2_ref,     # VMEM [1, Ppad]  f32
                o_ref):     # VMEM [TS, Ppad] compute dtype (bf16)
    # concat([x, aspect]) @ W1 + b1 == x @ W1_text + (aspect @ W1_aspect + b1)
    h = jnp.dot(x_ref[...], w1t_ref[...], preferred_element_type=jnp.float32)
    h = jnp.maximum(h + abias_ref[...], 0.0)             # ReLU
    # TODO(synk): nn.Dropout(0.3) is identity in eval mode; train-mode RNG dropout not implemented.
    out = (jnp.dot(h.astype(w2_ref.dtype), w2_ref[...],
                   preferred_element_type=jnp.float32) + b2_ref[...])
    o_ref[...] = out.astype(o_ref.dtype)                  # f32 accum, downcast at store


# ---------------------------------------------------------------------------
# Tiling / call helpers
# ---------------------------------------------------------------------------

# Cap at 1024 so the tile fits v5e's 16 MiB scoped-VMEM default without flags.
# TODO(synk): on v6e try TS=2048 with vmem_limit_bytes raised; re-derive on v7x (64 MiB VMEM).
_TS_CANDIDATES = (1024, 512, 384, 256, 128)


def _seq_tiling(S):
    """Return (padded_seq_len, seq_tile) with sublane/lane-friendly sizes."""
    for ts in _TS_CANDIDATES:
        if S % ts == 0:
            return S, ts
    if S <= _TS_CANDIDATES[0]:
        spad = ((S + 7) // 8) * 8            # sublane-aligned single tile
        return spad, spad
    spad = ((S + 127) // 128) * 128          # pad ragged S; rows sliced off later
    for ts in _TS_CANDIDATES:
        if spad % ts == 0:
            return spad, ts
    return spad, 128


def _ffn_pallas_call(x, aspect_bias, w1_text, w2p, b2p, *, ts, nt,
                     single_buffer_weights):
    B, Spad, H = x.shape
    Ppad = w2p.shape[1]
    # Constant-index weight/bias blocks: single-buffer to halve their VMEM cost.
    wkw = {"pipeline_mode": pl.Buffered(1)} if single_buffer_weights else {}
    return pl.pallas_call(
        _ffn_kernel,
        out_shape=jax.ShapeDtypeStruct((B, Spad, Ppad), x.dtype),
        grid_spec=pltpu.PrefetchScalarGridSpec(
            num_scalar_prefetch=0,
            grid=(B * nt,),                                  # flattened parallel grid
            in_specs=[
                pl.BlockSpec((pl.Squeezed(), ts, H), lambda g: (g // nt, g % nt, 0)),
                pl.BlockSpec((pl.Squeezed(), 1, H), lambda g: (g // nt, 0, 0)),
                pl.BlockSpec((H, H), lambda g: (0, 0), **wkw),
                pl.BlockSpec((H, Ppad), lambda g: (0, 0), **wkw),
                pl.BlockSpec((1, Ppad), lambda g: (0, 0), **wkw),
            ],
            out_specs=pl.BlockSpec((pl.Squeezed(), ts, Ppad),
                                   lambda g: (g // nt, g % nt, 0)),
        ),
        compiler_params=pltpu.CompilerParams(dimension_semantics=("parallel",)),
    )(x, aspect_bias, w1_text, w2p, b2p)


# ---------------------------------------------------------------------------
# Forward wrapper
# ---------------------------------------------------------------------------

def towe_first_last_meanpool(txt_embed, aspect_boundary_indices, w1, b1, w2, b2,
                             *, compute_dtype=jnp.bfloat16):
    """txt_embed: [B,S,H]; aspect_boundary_indices: [B,2] int;
       w1: [2H,H]; b1: [H]; w2: [H,P]; b2: [P]  (weights in [in,out] layout)."""
    B, S, H = txt_embed.shape
    P = w2.shape[1]
    Ppad = max(128, ((P + 127) // 128) * 128)   # lane-dense output columns
    Spad, TS = _seq_tiling(S)
    nt = Spad // TS

    # Feed compute-dtype activations straight from the encoder when possible;
    # only cast when the caller handed a different dtype (extra HBM pass).
    x = txt_embed if txt_embed.dtype == compute_dtype else txt_embed.astype(compute_dtype)

    w1_text = w1[:H].astype(compute_dtype)      # [H, H]
    w1_aspect = w1[H:].astype(compute_dtype)    # [H, H]
    b1_2d = b1.reshape(1, H).astype(jnp.float32)
    w2p = jnp.zeros((H, Ppad), compute_dtype).at[:, :P].set(w2.astype(compute_dtype))
    b2p = jnp.zeros((1, Ppad), jnp.float32).at[:, :P].set(b2.astype(jnp.float32))

    # ---- aspect gather (2 boundary rows) + mean-pool in plain JAX (tiny) ----
    idx = jnp.clip(aspect_boundary_indices.astype(jnp.int32), 0, S - 1)   # bounds-safe
    gathered = jnp.take_along_axis(
        x, jnp.broadcast_to(idx[:, :, None], (B, idx.shape[1], H)), axis=1)   # [B, 2, H]
    aspect_mean = jnp.mean(gathered.astype(jnp.float32), axis=1).astype(compute_dtype)

    # ---- prologue: ONE batched [B,H]@[H,H] matmul -> per-batch bias (incl. b1) ----
    aspect_bias = pl.pallas_call(
        _aspect_bias_kernel,
        out_shape=jax.ShapeDtypeStruct((B, H), jnp.float32),
    )(aspect_mean, w1_aspect, b1_2d)
    aspect_bias = aspect_bias[:, None, :]        # [B, 1, H] for per-batch blocking

    # ---- ragged S: pad rows (sliced off below) so tiles stay (8,128)-clean ----
    if Spad != S:
        x = jnp.pad(x, ((0, 0), (0, Spad - S), (0, 0)))

    # ---- main FFN over the flattened (batch * seq-tile) parallel grid ----
    try:
        out_pad = _ffn_pallas_call(x, aspect_bias, w1_text, w2p, b2p,
                                   ts=TS, nt=nt, single_buffer_weights=True)
    except Exception:
        # pipeline_mode=pl.Buffered(1) unsupported on this jax build -> default buffering.
        out_pad = _ffn_pallas_call(x, aspect_bias, w1_text, w2p, b2p,
                                   ts=TS, nt=nt, single_buffer_weights=False)

    # Slice the low-precision slab (cheap); the f32 cast touches only P real columns.
    # TODO(synk): consumers that can mask P classes should read out_pad directly.
    return out_pad[:, :S, :P].astype(jnp.float32)


def reference(txt_embed, idx, w1, b1, w2, b2):
    B, S, H = txt_embed.shape
    idx_exp = jnp.broadcast_to(idx[:, :, None], (B, idx.shape[1], H))
    gathered = jnp.take_along_axis(txt_embed, idx_exp, axis=1)      # [B, 2, H]
    aspect = jnp.mean(gathered, axis=1)                             # [B, H]
    aspect_rep = jnp.broadcast_to(aspect[:, None, :], (B, S, H))
    cat = jnp.concatenate([txt_embed, aspect_rep], axis=-1)         # [B, S, 2H]
    h = jnp.maximum(cat @ w1 + b1, 0.0)
    return h @ w2 + b2


if __name__ == "__main__":
    B, S, H, P = 2, 8, 128, 4            # batch, seq_len, bert_size, polarity_size
    vocab = 50

    key = jax.random.PRNGKey(0)
    k_emb, k_tok, k_w1, k_b1, k_w2, k_b2 = jax.random.split(key, 6)

    # --- glue: deterministic "embedding" standing in for the BERT encoder.
    #     Emits bf16 activations directly so the wrapper does no extra cast pass.
    embed_table = (jax.random.normal(k_emb, (vocab, H), dtype=jnp.float32) * 0.05
                   ).astype(jnp.bfloat16)
    text_tokens = jax.random.randint(k_tok, (B, S), 0, vocab)
    text_tokens_mask = jnp.ones((B, S), dtype=jnp.int32)            # consumed only by the encoder
    txt_embed = jnp.take(embed_table, text_tokens, axis=0)          # [B, S, H] bf16

    # aspect boundary indices (first token, last token of aspect span)
    aspect_boundary_indices = jnp.array([[2, 5], [1, 6]], dtype=jnp.int32)  # [B, 2]

    # --- FFN parameters, deterministic init, stored as [in, out] ---
    w1 = jax.random.normal(k_w1, (2 * H, H), dtype=jnp.float32) * 0.02
    b1 = jax.random.normal(k_b1, (H,), dtype=jnp.float32) * 0.02
    w2 = jax.random.normal(k_w2, (H, P), dtype=jnp.float32) * 0.02
    b2 = jax.random.normal(k_b2, (P,), dtype=jnp.float32) * 0.02

    out = towe_first_last_meanpool(txt_embed, aspect_boundary_indices, w1, b1, w2, b2)
    out = jax.block_until_ready(out)

    # Reference on the same bf16-quantized values (kernel keeps f32 accumulation
    # and downcasts only at the output store).
    xq = txt_embed.astype(jnp.float32)
    w1q = w1.astype(jnp.bfloat16).astype(jnp.float32)
    w2q = w2.astype(jnp.bfloat16).astype(jnp.float32)
    ref = reference(xq, aspect_boundary_indices, w1q, b1, w2q, b2)

    assert out.shape == (B, S, P)
    assert jnp.allclose(out, ref, atol=2e-3, rtol=1e-2), "mismatch vs reference"

    print("KERNEL_OK")
</pallas_src>

<mosaic_0001>
module attributes {stable_mosaic.version = 11 : i64} {
  func.func @_aspect_bias_kernel(%arg0: memref<2x128xbf16, #tpu.memory_space<vmem>>, %arg1: memref<128x128xbf16, #tpu.memory_space<vmem>>, %arg2: memref<1x128xf32, #tpu.memory_space<vmem>>, %arg3: memref<2x128xf32, #tpu.memory_space<vmem>>) attributes {dimension_semantics = [], scalar_prefetch = 0 : i64, scratch_operands = 0 : i64, tpu.core_type = #tpu.core_type<tc>} {
    %c0 = arith.constant 0 : index
    %c0_0 = arith.constant 0 : index
    %0 = vector.load %arg0[%c0, %c0_0] : memref<2x128xbf16, #tpu.memory_space<vmem>>, vector<2x128xbf16>
    %c0_1 = arith.constant 0 : index
    %c0_2 = arith.constant 0 : index
    %1 = vector.load %arg1[%c0_1, %c0_2] : memref<128x128xbf16, #tpu.memory_space<vmem>>, vector<128x128xbf16>
    %cst = arith.constant dense<0.000000e+00> : vector<2x128xf32>
    %2 = tpu.matmul %0, %1, %cst {dimension_numbers = #tpu.dot_dimension_numbers<[1], [0], [0], [1], [0, 0, 1, 1], [], []>} : vector<2x128xbf16>, vector<128x128xbf16>, vector<2x128xf32> -> vector<2x128xf32>
    %c0_3 = arith.constant 0 : index
    %c0_4 = arith.constant 0 : index
    %3 = vector.load %arg2[%c0_3, %c0_4] : memref<1x128xf32, #tpu.memory_space<vmem>>, vector<1x128xf32>
    %4 = vector.broadcast %3 : vector<1x128xf32> to vector<2x128xf32>
    %5 = arith.addf %2, %4 : vector<2x128xf32>
    %c0_5 = arith.constant 0 : index
    %c0_6 = arith.constant 0 : index
    %6 = vector.load %arg3[%c0_5, %c0_6] : memref<2x128xf32, #tpu.memory_space<vmem>>, vector<2x128xf32>
    tpu.vector_store %arg3[%c0_5, %c0_6], %5 {strides = array<i32>} : memref<2x128xf32, #tpu.memory_space<vmem>>, vector<2x128xf32>,
    return
  }
}

</mosaic_0001>

<bundles_post_ra>
// kernel: tpu_custom_call.1
= control target key start
LH: loop header
LB: loop body
LE: loop exit
PB: predicated region body
PF: predicated region fallthrough
CT: control target
= control target key end

     0   :  { %8 = vsyncpa [#allocation3], 0  ;;  %s329_s0 = inlined_call_operand.hbm [shape: bf16[2,128], index: 0, kind: input, shape index: {}]   ;;  %s330_s1 = inlined_call_operand.hbm [shape: bf16[128,128], index: 1, kind: input, shape index: {}]   ;;  %s331_s2 = inlined_call_operand.vmem [shape: f32[1,128], index: 2, kind: input, shape index: {}]   ;;  %s332_s3 = inlined_call_operand.hbm [shape: f32[2,128], index: 3, kind: output, shape index: {}]  }
   0x1   :  { %9 = vsyncpa [#allocation6], 0 }
   0x2   :  { %10 = vsyncpa [#allocation4], 0  ;;  %s290_s12 = smov [#allocation2]   ;;  %s291_s14 = smov [#allocation5]  }
   0x3   :  { %s17_s13 = sshll.u32 %s290_s12, 4  ;;  %s26_s15 = sshll.u32 %s291_s14, 4  ;;  %s18_s13 = int_to_ptr.vmem [resolvable:$true] %s17_s13  ;;  %s27_s15 = int_to_ptr.vmem [resolvable:$true] %s26_s15 }
   0x4   :  { %s232_s16 = scalar_lea.vmem %s18_s13, 16  ;;  %s236_s17 = scalar_lea.vmem %s18_s13, 32 }
   0x5   :  { %p233_p0 = scmp.ne.s32.totalorder %s18_s13, %s232_s16  ;;  %p237_p1 = scmp.lt.s32.totalorder %s18_s13, %s18_s13 }
   0x6   :  { %p238_p2 = scmp.lt.s32.totalorder %s236_s17, %s232_s16 }
   0x8   :  { %p239_p3 = por %p238_p2, %p237_p1 }
   0xa   :  { %p240_p4 = pnand %p239_p3, %p233_p0 }
   0xc   :  { %243 = shalt.err (!%p240_p4)
}
   0xd   :  { %20 = dma.hbm_to_vmem [thread:$0]  %s329_s0, 16, %s18_s13, [#allocation3]  }
   0xe   :  { %s252_s20 = scalar_lea.vmem %s27_s15, 1024  ;;  %p257_p6 = scmp.lt.s32.totalorder %s27_s15, %s27_s15 }
   0xf   :  { %p253_p5 = scmp.ne.s32.totalorder %s27_s15, %s252_s20  ;;  %p258_p7 = scmp.lt.s32.totalorder %s252_s20, %s252_s20 }
  0x11   :  { %p259_p8 = por %p258_p7, %p257_p6 }
  0x13   :  { %p260_p9 = pnand %p259_p8, %p253_p5 }
  0x15   :  { %263 = shalt.err (!%p260_p9)
}
  0x16   :  { %s292_s21 = smov 64   ;;  %s293_s22 = smov 4  }
  0x17   :  { %32 = dma.hbm_to_vmem [thread:$0]  %s330_s1, 1024, %s27_s15, [#allocation6], %s292_s21, %s292_s21, %s293_s22  }
  0x18   :  { %284 = dma.done.wait [#allocation3], 16  }
  0x19   :  { %285 = vsyncadd [#allocation3], 4294967280 }
  0x1a   :  { %286 = dma.done.wait [#allocation6], 1024  }
  0x1b   :  { %287 = vsyncadd [#allocation6], 4294966272  ;;  %v294_v0 = vmov 0.0   ;;  %vm295_vm0 = vmmov 0   ;;  %v216_v1 = vld [vmem:[#allocation5 + $0x38] sm:$0xff]   ;;  %v217_v2 = vld [vmem:[#allocation5 + $0x30] sm:$0xff]  }
  0x1c   :  { %189 = vmatprep.subr.bf16.mxu0 %v294_v0  ;;  %205 = vmatprep.mubr.msk.bf16.mxu0 %vm295_vm0, %v294_v0  ;;  %v218_v3 = vld [vmem:[#allocation5 + $0x28] sm:$0xff]   ;;  %v219_v4 = vld [vmem:[#allocation5 + $0x20] sm:$0xff]   ;;  %v220_v5 = vld [vmem:[#allocation5 + $0x18] sm:$0xff]   ;;  %s296_s25 = smov [#allocation7]  }
  0x1d   :  { %190 = vmatpush3.bf16.msra.mxu0 %v216_v1  ;;  %v221_v6 = vld [vmem:[#allocation5 + $0x10] sm:$0xff]   ;;  %v222_v7 = vld [vmem:[#allocation5 + $0x8] sm:$0xff]   ;;  %v223_v8 = vld [vmem:[#allocation5] sm:$0xff]   ;;  %s161_s26 = sshll.u32 %s296_s25, 4  ;;  %s162_s26 = int_to_ptr.vmem [resolvable:$true] %s161_s26 }
  0x1e   :  { %191 = vmatprep.subr.bf16.mxu0 %v294_v0  ;;  %v42_v9 = vld [vmem:[#allocation2] sm:$0x1]  ;;  %s264_s27 = scalar_lea.vmem %s162_s26, 32  ;;  %p269_p11 = scmp.lt.s32.totalorder %s162_s26, %s162_s26 }
  0x1f   :  { %v171_v10 = vld [vmem:[%s331_s2] ss:$0 sm:$0xff]  ;;  %p265_p10 = scmp.ne.s32.totalorder %s162_s26, %s264_s27  ;;  %p270_p12 = scmp.lt.s32.totalorder %s264_s27, %s264_s27 }
  0x21   :  { %192 = vmatpush3.bf16.msra.mxu0 %v217_v2  ;;  %p271_p13 = por %p270_p12, %p269_p11 }
  0x22   :  { %193 = vmatprep.subr.bf16.mxu0 %v294_v0 }
  0x23   :  { %p272_p0 = pnand %p271_p13, %p265_p10 }
  0x25   :  { %194 = vmatpush3.bf16.msra.mxu0 %v218_v3 }
  0x26   :  { %195 = vmatprep.subr.bf16.mxu0 %v294_v0 }
  0x29   :  { %196 = vmatpush3.bf16.msra.mxu0 %v219_v4 }
  0x2a   :  { %197 = vmatprep.subr.bf16.mxu0 %v294_v0 }
  0x2d   :  { %198 = vmatpush3.bf16.msra.mxu0 %v220_v5 }
  0x2e   :  { %199 = vmatprep.subr.bf16.mxu0 %v294_v0 }
  0x31   :  { %200 = vmatpush3.bf16.msra.mxu0 %v221_v6 }
  0x32   :  { %201 = vmatprep.subr.bf16.mxu0 %v294_v0 }
  0x35   :  { %202 = vmatpush3.bf16.msra.mxu0 %v222_v7 }
  0x36   :  { %203 = vmatprep.subr.bf16.mxu0 %v294_v0 }
  0x39   :  { %204 = vmatpush3.bf16.msra.mxu0 %v223_v8 }
  0x3c   :  { %206 = vmatmul.mubr.bf16.vlgmr.msra.gmra.mxu0 %v42_v9 }
  0xfc   :  { %v148_v11 = vpop.f32.mrf.mxu0 }
  0xfd   :  { %v149_v12 = vadd.f32 %v171_v10, %v148_v11 }
  0xfe   :  { %v207_v13 = vpop.f32.mrf.mxu0 }
  0xff   :  { %154 = vst [vmem:[#allocation7] sm:$0x3] %v149_v12 }
 0x100   :  { %v151_v14 = vpop.f32.mrf.mxu0 }
 0x101   :  { %275 = shalt.err (!%p272_p0)
}
 0x102   :  { %164 = dma.vmem_to_hbm [thread:$0]  %s162_s26, 32, %s332_s3, [#allocation4]   ;;  %v208_v15 = vpop.f32.mrf.mxu0 }
 0x103   :  { %288 = dma.done.wait [#allocation4], 32  }
 0x104   :  { %289 = vsyncadd [#allocation4], 4294967264 }
 0x105   :  { %168 = vsyncpa [#allocation3], 1 }
 0x106   :  { %169 = vsyncpa [#allocation6], 1 }
 0x107   :  { %170 = vsyncpa [#allocation4], 1 }

</bundles_post_ra>
